<compile_context>
chip_gen: v6e
topology: v6e:2x2x1
jax: 0.10.0
libtpu: 0.0.40
codegen_flags: <defaults>
</compile_context>

<pallas_src>
import functools

import jax
import jax.numpy as jnp
from jax.experimental import pallas as pl
from jax.experimental.pallas import tpu as pltpu

MARGIN = 1.0
EPS = 1e-9

LANES = 1024            # lane-dense tile width (multiple of 128)
MAX_TILE_ROWS = 512     # 512 x 1024 f32 = 2 MiB per input block
NUM_SPLITS = 2          # leading "parallel" grid axis (megacore on v7x)
_PALLAS_MIN_ELEMENTS = 1 << 15   # below this, fused XLA wins on launch overhead


def _round_up(x: int, m: int) -> int:
    return -(-x // m) * m


def _contrastive_loss_kernel(d_ref, t_ref, out_ref, acc_ref, *, margin, eps):
    i = pl.program_id(1)   # reduction ("arbitrary") axis

    @pl.when(i == 0)
    def _init():
        acc_ref[...] = jnp.zeros_like(acc_ref)
        out_ref[...] = jnp.zeros_like(out_ref)

    # Widen to f32 in-kernel (VPU math stays f32; HBM traffic stays narrow).
    d = d_ref[...].astype(jnp.float32)
    t = t_ref[...].astype(jnp.float32)

    pos_term = (1.0 - t) * (d * d)
    hinge = jnp.maximum(margin - (d + eps), 0.0)
    neg_term = t * (hinge * hinge)

    # Pure elementwise accumulate in the hot loop (no cross-lane reduce here).
    acc_ref[...] += 0.5 * (pos_term + neg_term)

    @pl.when(i == pl.num_programs(1) - 1)
    def _finalize():
        total = jnp.sum(acc_ref[...])                      # one XLU reduce / split
        out_ref[...] = jnp.broadcast_to(total, out_ref.shape).astype(jnp.float32)


def _contrastive_loss_jnp(distance, target, margin=MARGIN, eps=EPS):
    d = distance.astype(jnp.float32)
    t = target.astype(jnp.float32)
    losses = 0.5 * ((1.0 - t) * d * d + t * jnp.maximum(margin - (d + eps), 0.0) ** 2)
    return losses.mean()


def contrastive_loss(distance, target, margin=MARGIN, eps=EPS, force_pallas=False):
    """distance, target: same shape; returns scalar mean contrastive loss."""
    assert distance.shape == target.shape
    n = int(distance.size)

    if not force_pallas and n < _PALLAS_MIN_ELEMENTS:
        # Tiny problem: kernel launch + DMA setup dominates; fused XLA is faster.
        return _contrastive_loss_jnp(distance, target, margin, eps)

    flat_d = distance.reshape(-1)
    flat_t = target.reshape(-1)

    rows = _round_up(max(1, -(-n // LANES)), 8)        # sublane-aligned row count
    tile_rows = min(MAX_TILE_ROWS, rows)
    num_splits = NUM_SPLITS if rows >= NUM_SPLITS * tile_rows else 1
    padded_rows = _round_up(rows, num_splits * tile_rows)
    tiles_per_split = padded_rows // (num_splits * tile_rows)
    padded_n = padded_rows * LANES

    if padded_n != n:
        # Zero padding contributes exactly 0: (1-0)*0^2 + 0*relu(...)^2 == 0.
        flat_d = jnp.pad(flat_d, (0, padded_n - n))
        flat_t = jnp.pad(flat_t, (0, padded_n - n))

    # No dtype cast here: ship native dtypes over HBM, widen inside the kernel.
    d2 = flat_d.reshape(padded_rows, LANES)
    t2 = flat_t.reshape(padded_rows, LANES)

    kernel = functools.partial(
        _contrastive_loss_kernel, margin=float(margin), eps=float(eps)
    )

    partials = pl.pallas_call(
        kernel,
        out_shape=jax.ShapeDtypeStruct((num_splits, 8, 128), jnp.float32),
        grid_spec=pltpu.PrefetchScalarGridSpec(
            num_scalar_prefetch=0,
            grid=(num_splits, tiles_per_split),
            in_specs=[
                pl.BlockSpec((tile_rows, LANES),
                             lambda s, i: (s * tiles_per_split + i, 0)),
                pl.BlockSpec((tile_rows, LANES),
                             lambda s, i: (s * tiles_per_split + i, 0)),
            ],
            out_specs=pl.BlockSpec((1, 8, 128), lambda s, i: (s, 0, 0)),
            scratch_shapes=[pltpu.VMEM((tile_rows, LANES), jnp.float32)],
        ),
        compiler_params=pltpu.CompilerParams(
            dimension_semantics=("parallel", "arbitrary")),
    )(d2, t2)

    # Each split's (1,8,128) block is a broadcast of its partial sum.
    total = jnp.sum(partials[:, 0, 0])
    # Mean over the *true* element count (padding contributed 0), via a
    # compile-time constant reciprocal instead of a divide.
    return total * jnp.float32(1.0 / n)


if __name__ == "__main__":
    key = jax.random.PRNGKey(0)
    k1, k2 = jax.random.split(key)

    # Batch of 1024 pair distances (small shape, per module semantics).
    batch = 1024
    distance = jax.random.uniform(k1, (batch,), dtype=jnp.float32) * 2.0
    # Binary target shipped as bf16 (exact for {0,1}); widened to f32 in-kernel.
    target = jax.random.bernoulli(k2, p=0.5, shape=(batch,)).astype(jnp.bfloat16)

    # Force the Pallas path so the kernel is exercised at this small size.
    loss = contrastive_loss(distance, target, margin=MARGIN, force_pallas=True)
    loss = jax.block_until_ready(loss)

    ref = _contrastive_loss_jnp(distance, target, margin=MARGIN, eps=EPS)
    assert jnp.allclose(loss, ref, rtol=1e-5, atol=1e-6), (loss, ref)

    # Auto-dispatch path (falls back to fused XLA at this tiny size).
    loss_auto = jax.block_until_ready(contrastive_loss(distance, target))
    assert jnp.allclose(loss_auto, ref, rtol=1e-5, atol=1e-6), (loss_auto, ref)

    print("KERNEL_OK")
</pallas_src>

<mosaic_0001>
module attributes {stable_mosaic.version = 11 : i64} {
  func.func @_contrastive_loss_kernel(%arg0: i32, %arg1: i32, %arg2: memref<8x1024xf32, #tpu.memory_space<vmem>>, %arg3: memref<8x1024xbf16, #tpu.memory_space<vmem>>, %arg4: memref<1x8x128xf32, #tpu.memory_space<vmem>>, %arg5: memref<8x1024xf32, #tpu.memory_space<vmem>>) attributes {dimension_semantics = [#tpu.dimension_semantics<parallel>, #tpu.dimension_semantics<arbitrary>], iteration_bounds = array<i64: 1, 1>, scalar_prefetch = 0 : i64, scratch_operands = 1 : i64, tpu.core_type = #tpu.core_type<tc>, window_params = [{transform_indices = @transform_0, window_bounds = array<i64: 8, 1024>}, {transform_indices = @transform_1, window_bounds = array<i64: 8, 1024>}, {transform_indices = @transform_2, window_bounds = array<i64: 1, 8, 128>}]} {
    %c0_i32 = arith.constant 0 : i32
    %0 = arith.cmpi eq, %arg1, %c0_i32 : i32
    %1 = arith.extui %0 : i1 to i32
    %c0_i32_0 = arith.constant 0 : i32
    %2 = arith.cmpi ne, %1, %c0_i32_0 : i32
    scf.if %2 {
      %cst_14 = arith.constant 0.000000e+00 : f32
      %27 = vector.broadcast %cst_14 : f32 to vector<8x1024xf32>
      %c0_15 = arith.constant 0 : index
      %c0_16 = arith.constant 0 : index
      %28 = vector.load %arg5[%c0_15, %c0_16] : memref<8x1024xf32, #tpu.memory_space<vmem>>, vector<8x1024xf32>
      tpu.vector_store %arg5[%c0_15, %c0_16], %27 {strides = array<i32>} : memref<8x1024xf32, #tpu.memory_space<vmem>>, vector<8x1024xf32>,
      %cst_17 = arith.constant 0.000000e+00 : f32
      %29 = vector.broadcast %cst_17 : f32 to vector<1x8x128xf32>
      %c0_18 = arith.constant 0 : index
      %c0_19 = arith.constant 0 : index
      %c0_20 = arith.constant 0 : index
      %30 = vector.load %arg4[%c0_18, %c0_19, %c0_20] : memref<1x8x128xf32, #tpu.memory_space<vmem>>, vector<1x8x128xf32>
      tpu.vector_store %arg4[%c0_18, %c0_19, %c0_20], %29 {strides = array<i32>} : memref<1x8x128xf32, #tpu.memory_space<vmem>>, vector<1x8x128xf32>,
    } else {
    }
    %c0 = arith.constant 0 : index
    %c0_1 = arith.constant 0 : index
    %3 = vector.load %arg2[%c0, %c0_1] : memref<8x1024xf32, #tpu.memory_space<vmem>>, vector<8x1024xf32>
    %c0_2 = arith.constant 0 : index
    %c0_3 = arith.constant 0 : index
    %4 = vector.load %arg3[%c0_2, %c0_3] : memref<8x1024xbf16, #tpu.memory_space<vmem>>, vector<8x1024xbf16>
    %5 = arith.extf %4 : vector<8x1024xbf16> to vector<8x1024xf32>
    %cst = arith.constant 1.000000e+00 : f32
    %6 = vector.broadcast %cst : f32 to vector<8x1024xf32>
    %7 = arith.subf %6, %5 : vector<8x1024xf32>
    %8 = arith.mulf %3, %3 : vector<8x1024xf32>
    %9 = arith.mulf %7, %8 : vector<8x1024xf32>
    %cst_4 = arith.constant 9.99999971E-10 : f32
    %10 = vector.broadcast %cst_4 : f32 to vector<8x1024xf32>
    %11 = arith.addf %3, %10 : vector<8x1024xf32>
    %cst_5 = arith.constant 1.000000e+00 : f32
    %12 = vector.broadcast %cst_5 : f32 to vector<8x1024xf32>
    %13 = arith.subf %12, %11 : vector<8x1024xf32>
    %cst_6 = arith.constant 0.000000e+00 : f32
    %14 = vector.broadcast %cst_6 : f32 to vector<8x1024xf32>
    %15 = arith.maximumf %13, %14 : vector<8x1024xf32>
    %16 = arith.mulf %15, %15 : vector<8x1024xf32>
    %17 = arith.mulf %5, %16 : vector<8x1024xf32>
    %c0_7 = arith.constant 0 : index
    %c0_8 = arith.constant 0 : index
    %18 = vector.load %arg5[%c0_7, %c0_8] : memref<8x1024xf32, #tpu.memory_space<vmem>>, vector<8x1024xf32>
    %19 = arith.addf %9, %17 : vector<8x1024xf32>
    %cst_9 = arith.constant 5.000000e-01 : f32
    %20 = vector.broadcast %cst_9 : f32 to vector<8x1024xf32>
    %21 = arith.mulf %20, %19 : vector<8x1024xf32>
    %22 = arith.addf %18, %21 : vector<8x1024xf32>
    %c0_10 = arith.constant 0 : index
    %c0_11 = arith.constant 0 : index
    %23 = vector.load %arg5[%c0_10, %c0_11] : memref<8x1024xf32, #tpu.memory_space<vmem>>, vector<8x1024xf32>
    tpu.vector_store %arg5[%c0_10, %c0_11], %22 {strides = array<i32>} : memref<8x1024xf32, #tpu.memory_space<vmem>>, vector<8x1024xf32>,
    %c0_i32_12 = arith.constant 0 : i32
    %24 = arith.cmpi eq, %arg1, %c0_i32_12 : i32
    %25 = arith.extui %24 : i1 to i32
    %c0_i32_13 = arith.constant 0 : i32
    %26 = arith.cmpi ne, %25, %c0_i32_13 : i32
    scf.if %26 {
      %c0_14 = arith.constant 0 : index
      %c0_15 = arith.constant 0 : index
      %27 = vector.load %arg5[%c0_14, %c0_15] : memref<8x1024xf32, #tpu.memory_space<vmem>>, vector<8x1024xf32>
      %28 = vector.shape_cast %27 : vector<8x1024xf32> to vector<1x8x1024xf32>
      %cst_16 = arith.constant dense<0.000000e+00> : vector<1xf32>
      %29 = vector.multi_reduction <add>, %28, %cst_16 [1, 2] : vector<1x8x1024xf32> to vector<1xf32>
      %30 = vector.shape_cast %29 : vector<1xf32> to vector<1x1x1xf32>
      %31 = vector.extract %30[0, 0, 0] : f32 from vector<1x1x1xf32>
      %32 = vector.broadcast %31 : f32 to vector<1x8x128xf32>
      %c0_17 = arith.constant 0 : index
      %c0_18 = arith.constant 0 : index
      %c0_19 = arith.constant 0 : index
      %33 = vector.load %arg4[%c0_17, %c0_18, %c0_19] : memref<1x8x128xf32, #tpu.memory_space<vmem>>, vector<1x8x128xf32>
      tpu.vector_store %arg4[%c0_17, %c0_18, %c0_19], %32 {strides = array<i32>} : memref<1x8x128xf32, #tpu.memory_space<vmem>>, vector<1x8x128xf32>,
    } else {
    }
    return
  }
  func.func @transform_0(%arg0: i32, %arg1: i32) -> (i32, i32) {
    %c1_i32 = arith.constant 1 : i32
    %0 = arith.muli %arg0, %c1_i32 : i32
    %1 = arith.addi %0, %arg1 : i32
    %c0_i32 = arith.constant 0 : i32
    %c0_i32_0 = arith.constant 0 : i32
    return %1, %c0_i32 : i32, i32
  }
  func.func @transform_1(%arg0: i32, %arg1: i32) -> (i32, i32) {
    %c1_i32 = arith.constant 1 : i32
    %0 = arith.muli %arg0, %c1_i32 : i32
    %1 = arith.addi %0, %arg1 : i32
    %c0_i32 = arith.constant 0 : i32
    %c0_i32_0 = arith.constant 0 : i32
    return %1, %c0_i32 : i32, i32
  }
  func.func @transform_2(%arg0: i32, %arg1: i32) -> (i32, i32, i32) {
    %c0_i32 = arith.constant 0 : i32
    %c0_i32_0 = arith.constant 0 : i32
    %c0_i32_1 = arith.constant 0 : i32
    return %arg0, %c0_i32, %c0_i32_0 : i32, i32, i32
  }
}

</mosaic_0001>

<bundles_post_ra>
// kernel: tpu_custom_call.1
= control target key start
LH: loop header
LB: loop body
LE: loop exit
PB: predicated region body
PF: predicated region fallthrough
CT: control target
= control target key end

     0   :  { %7 = vsyncpa [#allocation4], 0  ;;  %s351_s0 = inlined_call_operand.hbm [shape: f32[8,1024], index: 0, kind: input, shape index: {}]   ;;  %s352_s1 = inlined_call_operand.hbm [shape: bf16[8,1024], index: 1, kind: input, shape index: {}]   ;;  %s353_s2 = inlined_call_operand.hbm [shape: f32[1,8,128], index: 2, kind: output, shape index: {}]  }
   0x1   :  { %8 = vsyncpa [#allocation7], 0 }
   0x2   :  { %9 = vsyncpa [#allocation5], 0  ;;  %s300_s9 = smov [#allocation3]   ;;  %s301_s11 = smov [#allocation6]  }
   0x3   :  { %s20_s10 = sshll.u32 %s300_s9, 4  ;;  %s34_s12 = sshll.u32 %s301_s11, 4  ;;  %s21_s10 = int_to_ptr.vmem [resolvable:$true] %s20_s10  ;;  %s35_s12 = int_to_ptr.vmem [resolvable:$true] %s34_s12 }
   0x4   :  { %s242_s13 = scalar_lea.vmem %s21_s10, 1024  ;;  %p247_p1 = scmp.lt.s32.totalorder %s21_s10, %s21_s10 }
   0x5   :  { %p243_p0 = scmp.ne.s32.totalorder %s21_s10, %s242_s13  ;;  %p248_p2 = scmp.lt.s32.totalorder %s242_s13, %s242_s13 }
   0x7   :  { %p249_p3 = por %p248_p2, %p247_p1 }
   0x9   :  { %p250_p4 = pnand %p249_p3, %p243_p0 }
   0xb   :  { %253 = shalt.err (!%p250_p4)
}
   0xc   :  { %23 = dma.hbm_to_vmem [thread:$0]  %s351_s0, 1024, %s21_s10, [#allocation4]  }
   0xd   :  { %s262_s16 = scalar_lea.vmem %s35_s12, 512  ;;  %p267_p6 = scmp.lt.s32.totalorder %s35_s12, %s35_s12 }
   0xe   :  { %p263_p5 = scmp.ne.s32.totalorder %s35_s12, %s262_s16  ;;  %p268_p7 = scmp.lt.s32.totalorder %s262_s16, %s262_s16 }
  0x10   :  { %p269_p8 = por %p268_p7, %p267_p6 }
  0x12   :  { %p270_p9 = pnand %p269_p8, %p263_p5 }
  0x14   :  { %273 = shalt.err (!%p270_p9)
}
  0x15   :  { %37 = dma.hbm_to_vmem [thread:$0]  %s352_s1, 512, %s35_s12, [#allocation7]  }
  0x16   :  { %294 = dma.done.wait [#allocation4], 1024  }
  0x17   :  { %295 = vsyncadd [#allocation4], 4294966272 }
  0x18   :  { %296 = dma.done.wait [#allocation7], 512  }
  0x19   :  { %297 = vsyncadd [#allocation7], 4294966784  ;;  %v59_v0 = vld [vmem:[#allocation3] sm:$0xff]  ;;  %v60_v1 = vld [vmem:[#allocation3 + $0x8] sm:$0xff]  ;;  %s302_s0 = smov [#allocation8]  }
  0x1a   :  { %v61_v2 = vld [vmem:[#allocation3 + $0x10] sm:$0xff]  ;;  %v62_v3 = vld [vmem:[#allocation3 + $0x18] sm:$0xff]  ;;  %v324_v4 = vld [vmem:[#allocation6] sm:$0xff]  ;;  %v87_v5 = vmul.f32 %v59_v0, %v59_v0  ;;  %v88_v6 = vmul.f32 %v60_v1, %v60_v1  ;;  %v103_v14 = vadd.f32 1e-09, %v59_v0  ;;  %s218_s1 = sshll.u32 %s302_s0, 4  ;;  %s219_s1 = int_to_ptr.vmem [resolvable:$true] %s218_s1 }
  0x1b   :  { %v89_v7 = vmul.f32 %v61_v2, %v61_v2  ;;  %v326_v8 = vld [vmem:[#allocation6 + $0x8] sm:$0xff]  ;;  %v328_v9 = vld [vmem:[#allocation6 + $0x10] sm:$0xff]  ;;  %v330_v10 = vld [vmem:[#allocation6 + $0x18] sm:$0xff]  ;;  %v71_v11 = vunpack.c.l.bf16 %v324_v4  ;;  %v72_v12 = vunpack.c.h.bf16 %v324_v4  ;;  %v90_v13 = vmul.f32 %v62_v3, %v62_v3  ;;  %s274_s20 = scalar_lea.vmem %s219_s1, 128  ;;  %p279_p11 = scmp.lt.s32.totalorder %s219_s1, %s219_s1 }
  0x1c   :  { %v73_v15 = vunpack.c.l.bf16 %v326_v8  ;;  %v74_v16 = vunpack.c.h.bf16 %v326_v8  ;;  %v75_v17 = vunpack.c.l.bf16 %v328_v9  ;;  %v76_v18 = vunpack.c.h.bf16 %v328_v9  ;;  %v63_v19 = vld [vmem:[#allocation3 + $0x20] sm:$0xff]  ;;  %v64_v20 = vld [vmem:[#allocation3 + $0x28] sm:$0xff]  ;;  %v65_v25 = vld [vmem:[#allocation3 + $0x30] sm:$0xff]  ;;  %p275_p10 = scmp.ne.s32.totalorder %s219_s1, %s274_s20  ;;  %p280_p12 = scmp.lt.s32.totalorder %s274_s20, %s274_s20 }
  0x1d   :  { %v77_v21 = vunpack.c.l.bf16 %v330_v10  ;;  %v78_v22 = vunpack.c.h.bf16 %v330_v10  ;;  %v79_v23 = vsub.f32 1.0, %v71_v11  ;;  %v80_v24 = vsub.f32 1.0, %v72_v12  ;;  %v66_v26 = vld [vmem:[#allocation3 + $0x38] sm:$0xff] }
  0x1e   :  { %v81_v27 = vsub.f32 1.0, %v73_v15  ;;  %v82_v28 = vsub.f32 1.0, %v74_v16  ;;  %v91_v29 = vmul.f32 %v63_v19, %v63_v19  ;;  %v92_v30 = vmul.f32 %v64_v20, %v64_v20  ;;  %p281_p13 = por %p280_p12, %p279_p11 }
  0x1f   :  { %v83_v31 = vsub.f32 1.0, %v75_v17  ;;  %v93_v32 = vmul.f32 %v65_v25, %v65_v25  ;;  %v94_v33 = vmul.f32 %v66_v26, %v66_v26  ;;  %v104_v34 = vadd.f32 1e-09, %v60_v1 }
  0x20   :  { %v84_v35 = vsub.f32 1.0, %v76_v18  ;;  %v85_v36 = vsub.f32 1.0, %v77_v21  ;;  %v86_v37 = vsub.f32 1.0, %v78_v22  ;;  %v95_v38 = vmul.f32 %v87_v5, %v79_v23  ;;  %p282_p0 = pnand %p281_p13, %p275_p10 }
  0x21   :  { %v96_v39 = vmul.f32 %v88_v6, %v80_v24  ;;  %v97_v40 = vmul.f32 %v89_v7, %v81_v27  ;;  %v105_v41 = vadd.f32 1e-09, %v61_v2  ;;  %v106_v42 = vadd.f32 1e-09, %v62_v3 }
  0x22   :  { %v98_v43 = vmul.f32 %v90_v13, %v82_v28  ;;  %v107_v44 = vadd.f32 1e-09, %v63_v19  ;;  %v108_v45 = vadd.f32 1e-09, %v64_v20  ;;  %v109_v46 = vadd.f32 1e-09, %v65_v25 }
  0x23   :  { %v110_v47 = vadd.f32 1e-09, %v66_v26  ;;  %v111_v48 = vsub.f32 1.0, %v103_v14  ;;  %v112_v49 = vsub.f32 1.0, %v104_v34  ;;  %v113_v50 = vsub.f32 1.0, %v105_v41 }
  0x24   :  { %v114_v51 = vsub.f32 1.0, %v106_v42  ;;  %v115_v52 = vsub.f32 1.0, %v107_v44  ;;  %v116_v53 = vsub.f32 1.0, %v108_v45  ;;  %v117_v54 = vsub.f32 1.0, %v109_v46 }
  0x25   :  { %v118_v55 = vsub.f32 1.0, %v110_v47  ;;  %v119_v56 = vmax.f32 %v111_v48, 0.0  ;;  %v120_v57 = vmax.f32 %v112_v49, 0.0  ;;  %v121_v58 = vmax.f32 %v113_v50, 0.0 }
  0x26   :  { %v122_v59 = vmax.f32 %v114_v51, 0.0  ;;  %v123_v60 = vmax.f32 %v115_v52, 0.0  ;;  %v124_v61 = vmax.f32 %v116_v53, 0.0  ;;  %v125_v62 = vmax.f32 %v117_v54, 0.0 }
  0x27   :  { %v126_v63 = vmax.f32 %v118_v55, 0.0  ;;  %v127_v0 = vmul.f32 %v119_v56, %v119_v56  ;;  %v128_v1 = vmul.f32 %v120_v57, %v120_v57  ;;  %v129_v2 = vmul.f32 %v121_v58, %v121_v58 }
  0x28   :  { %v130_v3 = vmul.f32 %v122_v59, %v122_v59  ;;  %v131_v4 = vmul.f32 %v123_v60, %v123_v60  ;;  %v132_v5 = vmul.f32 %v124_v61, %v124_v61  ;;  %v133_v6 = vmul.f32 %v125_v62, %v125_v62 }
  0x29   :  { %v99_v7 = vmul.f32 %v91_v29, %v83_v31  ;;  %v135_v8 = vmul.f32 %v127_v0, %v71_v11  ;;  %v136_v9 = vmul.f32 %v128_v1, %v72_v12  ;;  %v137_v13 = vmul.f32 %v129_v2, %v73_v15 }
  0x2a   :  { %v100_v14 = vmul.f32 %v92_v30, %v84_v35  ;;  %v134_v19 = vmul.f32 %v126_v63, %v126_v63  ;;  %v138_v20 = vmul.f32 %v130_v3, %v74_v16  ;;  %v139_v23 = vmul.f32 %v131_v4, %v75_v17 }
  0x2b   :  { %v140_v24 = vmul.f32 %v132_v5, %v76_v18  ;;  %v151_v25 = vadd.f32 %v135_v8, %v95_v38  ;;  %v152_v26 = vadd.f32 %v136_v9, %v96_v39  ;;  %v153_v27 = vadd.f32 %v137_v13, %v97_v40 }
  0x2c   :  { %v101_v28 = vmul.f32 %v93_v32, %v85_v36  ;;  %v141_v34 = vmul.f32 %v133_v6, %v77_v21  ;;  %v154_v41 = vadd.f32 %v138_v20, %v98_v43  ;;  %v155_v42 = vadd.f32 %v139_v23, %v99_v7 }
  0x2d   :  { %v159_v44 = vmul.f32 0.5, %v151_v25  ;;  %v160_v45 = vmul.f32 0.5, %v152_v26  ;;  %v161_v29 = vmul.f32 0.5, %v153_v27  ;;  %v102_v11 = vmul.f32 %v94_v33, %v86_v37 }
  0x2e   :  { %v142_v12 = vmul.f32 %v134_v19, %v78_v22  ;;  %v156_v15 = vadd.f32 %v140_v24, %v100_v14  ;;  %v162_v16 = vmul.f32 0.5, %v154_v41  ;;  %v157_v18 = vadd.f32 %v141_v34, %v101_v28 }
  0x2f   :  { %v194_v17 = vadd.f32 %v160_v45, %v159_v44  ;;  %v163_v30 = vmul.f32 0.5, %v155_v42 }
  0x30   :  { %v158_v35 = vadd.f32 %v142_v12, %v102_v11  ;;  %v164_v32 = vmul.f32 0.5, %v156_v15  ;;  %v165_v38 = vmul.f32 0.5, %v157_v18 }
  0x31   :  { %v195_v31 = vadd.f32 %v194_v17, %v161_v29 }
  0x32   :  { %v166_v39 = vmul.f32 0.5, %v158_v35 }
  0x33   :  { %v196_v36 = vadd.f32 %v195_v31, %v162_v16 }
  0x35   :  { %v197_v21 = vadd.f32 %v196_v36, %v163_v30 }
  0x37   :  { %v198_v40 = vadd.f32 %v197_v21, %v164_v32 }
  0x39   :  { %v199_v43 = vadd.f32 %v198_v40, %v165_v38 }
  0x3b   :  { %v200_v46 = vadd.f32 %v199_v43, %v166_v39 }
  0x3d   :  { %201 = vadd.xlane.f32.xlu0 %v200_v46 }
  0xc6   :  { %v202_v33 = vpop.xlane.xlu0 %201 }
  0xc7   :  { %v203_v37 = vrot.slane %v202_v33, 4 }
  0xc9   :  { %v204_v10 = vadd.f32 %v203_v37, %v202_v33 }
  0xcb   :  { %v205_v22 = vrot.slane %v204_v10, 2 }
  0xcd   :  { %v206_v47 = vadd.f32 %v205_v22, %v204_v10 }
  0xcf   :  { %v207_v48 = vrot.slane %v206_v47, 1 }
  0xd1   :  { %v208_v49 = vadd.f32 %v207_v48, %v206_v47 }
  0xd3   :  { %228 = vpush %v208_v49 }
 0x104   :  { %s229_s19 = spop %228 }
 0x105   :  { %v210_v50 = vstv %s229_s19 }
 0x106   :  { %211 = vst [vmem:[#allocation8] sm:$0xff] %v210_v50 }
 0x107   :  { %285 = shalt.err (!%p282_p0)
}
 0x108   :  { %221 = dma.vmem_to_hbm [thread:$0]  %s219_s1, 128, %s353_s2, [#allocation5]  }
 0x109   :  { %298 = dma.done.wait [#allocation5], 128  }
 0x10a   :  { %299 = vsyncadd [#allocation5], 4294967168 }
 0x10b   :  { %225 = vsyncpa [#allocation4], 1 }
 0x10c   :  { %226 = vsyncpa [#allocation7], 1 }
 0x10d   :  { %227 = vsyncpa [#allocation5], 1 }

</bundles_post_ra>
